<compile_context>
chip_gen: v5e
topology: v5e:2x2
jax: 0.10.0
libtpu: 0.0.40
codegen_flags: <defaults>
</compile_context>

<pallas_src>
import functools

import jax
import jax.numpy as jnp
import numpy as np
from jax.experimental import pallas as pl
from jax.experimental.pallas import tpu as pltpu


_MIN_GRID_STEPS = 8  # aim for >= this many row-tile steps (pipelining/megacore)


def _round_up(v, m):
    return ((v + m - 1) // m) * m


def _round_down(v, m):
    return (v // m) * m


def _sublane_pack(dtype):
    # Native sublane packing: 8 rows for 32-bit, 16 for 16-bit, 32 for 8-bit.
    return {1: 32, 2: 16, 4: 8}.get(jnp.dtype(dtype).itemsize, 8)


def _vmem_budgets():
    """Generation-aware (slab_budget_bytes, vmem_limit_bytes)."""
    cap = None
    try:
        cap = getattr(pltpu.get_tpu_info(), "vmem_capacity_bytes", None)
    except Exception:
        cap = None
    if cap is None:
        cap = 64 << 20  # conservative (v7x-sized) if the query is unavailable
    if cap >= (100 << 20):
        # v5e / v6e: 128 MiB physical VMEM -> bigger tiles amortize per-step cost.
        return 12 << 20, 64 << 20
    # v7x: 64 MiB physical VMEM -> keep ~4x slab (double-buffered in+out) small.
    return 6 << 20, 40 << 20


def _pack_style(style_mean, style_std, nc):
    # Column 0 = style mean, column 1 = style std: one tiny DMA per grid step.
    return jnp.stack(
        [style_mean.reshape(nc).astype(jnp.float32),
         style_std.reshape(nc).astype(jnp.float32)], axis=1)  # (NC, 2)


# ----------------------------------------------------------------------------
# Path A: full H*W per block — stats + affine fused in one kernel
# ----------------------------------------------------------------------------
def _adain_fused_kernel(x_ref, style_ref, out_ref, *, hw, eps):
    x = x_ref[...].astype(jnp.float32)                       # (TR, HW)
    s = jnp.sum(x, axis=1, keepdims=True)                    # single pass:
    sq = jnp.sum(x * x, axis=1, keepdims=True)               # sum and sum(x^2)
    mean = s * (1.0 / hw)
    inv_nm1 = (1.0 / (hw - 1)) if hw > 1 else float("nan")   # torch unbiased var
    var = (sq - s * mean) * inv_nm1
    style = style_ref[...].astype(jnp.float32)               # (TR, 2)
    a = jax.lax.rsqrt(var + eps) * style[:, 1:2]              # scale
    b = style[:, 0:1] - mean * a                               # offset
    out_ref[...] = (x * a + b).astype(out_ref.dtype)


def _adain_fused_call(x, style, tile_rows, hw, eps, vmem_limit):
    nc = x.shape[0]
    grid = (pl.cdiv(nc, tile_rows),)
    kernel = functools.partial(_adain_fused_kernel, hw=hw, eps=eps)
    return pl.pallas_call(
        kernel,
        out_shape=jax.ShapeDtypeStruct((nc, hw), x.dtype),
        grid_spec=pltpu.PrefetchScalarGridSpec(
            num_scalar_prefetch=0,
            grid=grid,
            in_specs=[
                pl.BlockSpec((tile_rows, hw), lambda i: (i, 0)),   # content rows
                pl.BlockSpec((tile_rows, 2), lambda i: (i, 0)),    # packed style
            ],
            out_specs=pl.BlockSpec((tile_rows, hw), lambda i: (i, 0)),
        ),
        compiler_params=pltpu.CompilerParams(
            dimension_semantics=("parallel",),      # rows independent -> megacore
            vmem_limit_bytes=vmem_limit,
        ),
    )(x, style)


# ----------------------------------------------------------------------------
# Path B: very large H*W — split HW (P3 accumulator) + streaming apply
# ----------------------------------------------------------------------------
def _adain_stats_kernel(x_ref, style_ref, ab_ref, sum_sc, sq_sc,
                        *, hw, tile_hw, eps, need_mask):
    k = pl.program_id(1)

    @pl.when(k == 0)
    def _():
        sum_sc[...] = jnp.zeros_like(sum_sc)
        sq_sc[...] = jnp.zeros_like(sq_sc)

    x = x_ref[...].astype(jnp.float32)                       # (TR, THW)
    if need_mask:  # ragged HW edge: zero out-of-range lanes (zeros don't bias sums)
        lane = jax.lax.broadcasted_iota(jnp.int32, x.shape, 1) + k * tile_hw
        x = jnp.where(lane < hw, x, 0.0)
    sum_sc[...] += jnp.sum(x, axis=1, keepdims=True)
    sq_sc[...] += jnp.sum(x * x, axis=1, keepdims=True)

    @pl.when(k == pl.num_programs(1) - 1)
    def _():
        s = sum_sc[...]
        sq = sq_sc[...]
        mean = s * (1.0 / hw)
        inv_nm1 = (1.0 / (hw - 1)) if hw > 1 else float("nan")
        var = (sq - s * mean) * inv_nm1
        style = style_ref[...].astype(jnp.float32)           # (TR, 2)
        a = jax.lax.rsqrt(var + eps) * style[:, 1:2]
        b = style[:, 0:1] - mean * a
        ab_ref[...] = jnp.concatenate([a, b], axis=1)        # (TR, 2)


def _adain_apply_kernel(x_ref, ab_ref, out_ref):
    x = x_ref[...].astype(jnp.float32)
    ab = ab_ref[...]
    out_ref[...] = (x * ab[:, 0:1] + ab[:, 1:2]).astype(out_ref.dtype)


def _adain_stats_call(x, style, tile_rows, tile_hw, hw, eps, vmem_limit):
    nc = x.shape[0]
    grid = (pl.cdiv(nc, tile_rows), pl.cdiv(hw, tile_hw))
    kernel = functools.partial(_adain_stats_kernel, hw=hw, tile_hw=tile_hw,
                               eps=eps, need_mask=(hw % tile_hw) != 0)
    return pl.pallas_call(
        kernel,
        out_shape=jax.ShapeDtypeStruct((nc, 2), jnp.float32),
        grid_spec=pltpu.PrefetchScalarGridSpec(
            num_scalar_prefetch=0,
            grid=grid,
            in_specs=[
                pl.BlockSpec((tile_rows, tile_hw), lambda i, k: (i, k)),
                pl.BlockSpec((tile_rows, 2), lambda i, k: (i, 0)),
            ],
            out_specs=pl.BlockSpec((tile_rows, 2), lambda i, k: (i, 0)),
            scratch_shapes=[pltpu.VMEM((tile_rows, 1), jnp.float32),
                            pltpu.VMEM((tile_rows, 1), jnp.float32)],
        ),
        compiler_params=pltpu.CompilerParams(
            dimension_semantics=("parallel", "arbitrary"),   # HW = reduction axis
            vmem_limit_bytes=vmem_limit,
        ),
    )(x, style)


def _adain_apply_call(x, ab, tile_rows, tile_hw, vmem_limit):
    nc, hw = x.shape
    grid = (pl.cdiv(nc, tile_rows), pl.cdiv(hw, tile_hw))
    return pl.pallas_call(
        _adain_apply_kernel,
        out_shape=jax.ShapeDtypeStruct((nc, hw), x.dtype),
        grid_spec=pltpu.PrefetchScalarGridSpec(
            num_scalar_prefetch=0,
            grid=grid,
            in_specs=[
                pl.BlockSpec((tile_rows, tile_hw), lambda i, k: (i, k)),
                pl.BlockSpec((tile_rows, 2), lambda i, k: (i, 0)),
            ],
            out_specs=pl.BlockSpec((tile_rows, tile_hw), lambda i, k: (i, k)),
        ),
        compiler_params=pltpu.CompilerParams(
            dimension_semantics=("parallel", "parallel"),
            vmem_limit_bytes=vmem_limit,
        ),
    )(x, ab)


def _adain_split_hw_path(content, style_mean, style_std, *, tile_rows, tile_hw,
                         eps, vmem_limit):
    N, C, H, W = content.shape
    NC, HW = N * C, H * W
    x = content.reshape(NC, HW)
    style = _pack_style(style_mean, style_std, NC)
    ab = _adain_stats_call(x, style, tile_rows, tile_hw, HW, eps, vmem_limit)
    out = _adain_apply_call(x, ab, tile_rows, tile_hw, vmem_limit)
    return out.reshape(N, C, H, W)


# ----------------------------------------------------------------------------
# Public wrapper
# ----------------------------------------------------------------------------
def adain_set(content, style_mean, style_std, *, eps=1e-5):
    """content: (N, C, H, W); style_mean/style_std: reshapeable to (N*C,)."""
    N, C, H, W = content.shape
    NC, HW = N * C, H * W

    x = content.reshape(NC, HW)                      # contiguous, no copy
    style = _pack_style(style_mean, style_std, NC)

    pack = _sublane_pack(content.dtype)
    slab_budget, vmem_limit = _vmem_budgets()

    # Rows whose full-HW f32 slab fits the per-buffer budget (HW-aware, always).
    rows_budget = slab_budget // (HW * 4)

    if rows_budget >= pack:
        # Path A: each block holds full H*W; one fused kernel.
        budget_rows = max(pack, _round_down(rows_budget, pack))
        # Target >= ~_MIN_GRID_STEPS row tiles so pipelining/megacore engage.
        target_rows = max(pack, _round_down(pl.cdiv(NC, _MIN_GRID_STEPS), pack))
        tile_rows = max(pack, min(budget_rows, target_rows, _round_up(NC, pack)))
        out = _adain_fused_call(x, style, tile_rows, HW, eps, vmem_limit)
    else:
        # Path B: H*W too large for even a sublane-pack of rows -> split HW.
        tile_rows = pack
        tile_hw = max(128, _round_down(slab_budget // (pack * 4), 128))
        tile_hw = min(tile_hw, _round_up(HW, 128))
        ab = _adain_stats_call(x, style, tile_rows, tile_hw, HW, eps, vmem_limit)
        out = _adain_apply_call(x, ab, tile_rows, tile_hw, vmem_limit)

    return out.reshape(N, C, H, W)


# ----------------------------------------------------------------------------
# Plain-JAX reference (mirrors the PyTorch module, incl. unbiased variance)
# ----------------------------------------------------------------------------
def adain_set_reference(content, style_mean, style_std, eps=1e-5):
    N, C, H, W = content.shape
    flat = content.reshape(N, C, -1)
    mean = flat.mean(axis=2).reshape(N, C, 1, 1)
    var = flat.var(axis=2, ddof=1).reshape(N, C, 1, 1) + eps
    std = jnp.sqrt(var)
    normalized = (content - mean) / std
    return (normalized * style_std.reshape(N, C, 1, 1)
            + style_mean.reshape(N, C, 1, 1))


if __name__ == "__main__":
    key = jax.random.PRNGKey(0)
    kc, km, ks = jax.random.split(key, 3)

    N, C, H, W = 2, 4, 16, 16
    content = jax.random.normal(kc, (N, C, H, W), jnp.float32)
    style_mean = jax.random.normal(km, (N, C), jnp.float32)
    style_std = jnp.abs(jax.random.normal(ks, (N, C), jnp.float32)) + 0.5

    ref = adain_set_reference(content, style_mean, style_std)

    # Default (fused, full-HW) path.
    out = adain_set(content, style_mean, style_std)
    jax.block_until_ready(out)
    np.testing.assert_allclose(np.asarray(out), np.asarray(ref),
                               rtol=1e-4, atol=1e-4)

    # Exercise the HW-split fallback (accumulator over HW + streaming apply).
    out_split = _adain_split_hw_path(content, style_mean, style_std,
                                     tile_rows=8, tile_hw=128, eps=1e-5,
                                     vmem_limit=32 << 20)
    jax.block_until_ready(out_split)
    np.testing.assert_allclose(np.asarray(out_split), np.asarray(ref),
                               rtol=1e-4, atol=1e-4)

    print("KERNEL_OK")
</pallas_src>

<mosaic_0001>
module attributes {stable_mosaic.version = 11 : i64} {
  func.func @_adain_fused_kernel(%arg0: i32, %arg1: memref<8x256xf32, #tpu.memory_space<vmem>>, %arg2: memref<8x2xf32, #tpu.memory_space<vmem>>, %arg3: memref<8x256xf32, #tpu.memory_space<vmem>>) attributes {dimension_semantics = [#tpu.dimension_semantics<parallel>], iteration_bounds = array<i64: 1>, scalar_prefetch = 0 : i64, scratch_operands = 0 : i64, tpu.core_type = #tpu.core_type<tc>, window_params = [{transform_indices = @transform_0, window_bounds = array<i64: 8, 256>}, {transform_indices = @transform_1, window_bounds = array<i64: 8, 2>}, {transform_indices = @transform_2, window_bounds = array<i64: 8, 256>}]} {
    %c0 = arith.constant 0 : index
    %c0_0 = arith.constant 0 : index
    %0 = vector.load %arg1[%c0, %c0_0] : memref<8x256xf32, #tpu.memory_space<vmem>>, vector<8x256xf32>
    %cst = arith.constant dense<0.000000e+00> : vector<8xf32>
    %1 = vector.multi_reduction <add>, %0, %cst [1] : vector<8x256xf32> to vector<8xf32>
    %2 = vector.shape_cast %1 : vector<8xf32> to vector<8x1xf32>
    %3 = arith.mulf %0, %0 : vector<8x256xf32>
    %cst_1 = arith.constant dense<0.000000e+00> : vector<8xf32>
    %4 = vector.multi_reduction <add>, %3, %cst_1 [1] : vector<8x256xf32> to vector<8xf32>
    %5 = vector.shape_cast %4 : vector<8xf32> to vector<8x1xf32>
    %cst_2 = arith.constant 3.906250e-03 : f32
    %6 = vector.broadcast %cst_2 : f32 to vector<8x1xf32>
    %7 = arith.mulf %2, %6 : vector<8x1xf32>
    %8 = arith.mulf %2, %7 : vector<8x1xf32>
    %9 = arith.subf %5, %8 : vector<8x1xf32>
    %cst_3 = arith.constant 0.00392156886 : f32
    %10 = vector.broadcast %cst_3 : f32 to vector<8x1xf32>
    %11 = arith.mulf %9, %10 : vector<8x1xf32>
    %c0_4 = arith.constant 0 : index
    %c0_5 = arith.constant 0 : index
    %12 = vector.load %arg2[%c0_4, %c0_5] : memref<8x2xf32, #tpu.memory_space<vmem>>, vector<8x2xf32>
    %cst_6 = arith.constant 9.99999974E-6 : f32
    %13 = vector.broadcast %cst_6 : f32 to vector<8x1xf32>
    %14 = arith.addf %11, %13 : vector<8x1xf32>
    %15 = math.rsqrt %14 : vector<8x1xf32>
    %16 = vector.extract_strided_slice %12 {offsets = [0, 1], sizes = [8, 1], strides = [1, 1]} : vector<8x2xf32> to vector<8x1xf32>
    %17 = arith.mulf %15, %16 : vector<8x1xf32>
    %18 = vector.extract_strided_slice %12 {offsets = [0, 0], sizes = [8, 1], strides = [1, 1]} : vector<8x2xf32> to vector<8x1xf32>
    %19 = arith.mulf %7, %17 : vector<8x1xf32>
    %20 = arith.subf %18, %19 : vector<8x1xf32>
    %21 = vector.broadcast %17 : vector<8x1xf32> to vector<8x256xf32>
    %22 = arith.mulf %0, %21 : vector<8x256xf32>
    %23 = vector.broadcast %20 : vector<8x1xf32> to vector<8x256xf32>
    %24 = arith.addf %22, %23 : vector<8x256xf32>
    %c0_7 = arith.constant 0 : index
    %c0_8 = arith.constant 0 : index
    %25 = vector.load %arg3[%c0_7, %c0_8] : memref<8x256xf32, #tpu.memory_space<vmem>>, vector<8x256xf32>
    tpu.vector_store %arg3[%c0_7, %c0_8], %24 {strides = array<i32>} : memref<8x256xf32, #tpu.memory_space<vmem>>, vector<8x256xf32>,
    return
  }
  func.func @transform_0(%arg0: i32) -> (i32, i32) {
    %c0_i32 = arith.constant 0 : i32
    %c0_i32_0 = arith.constant 0 : i32
    return %arg0, %c0_i32 : i32, i32
  }
  func.func @transform_1(%arg0: i32) -> (i32, i32) {
    %c0_i32 = arith.constant 0 : i32
    %c0_i32_0 = arith.constant 0 : i32
    return %arg0, %c0_i32 : i32, i32
  }
  func.func @transform_2(%arg0: i32) -> (i32, i32) {
    %c0_i32 = arith.constant 0 : i32
    %c0_i32_0 = arith.constant 0 : i32
    return %arg0, %c0_i32 : i32, i32
  }
}

</mosaic_0001>

<bundles_post_ra>
// kernel: tpu_custom_call.1
= control target key start
LH: loop header
LB: loop body
LE: loop exit
PB: predicated region body
PF: predicated region fallthrough
CT: control target
= control target key end

     0   :  { %7 = vsyncpa [#allocation3], 0  ;;  %s183_s0 = inlined_call_operand.hbm [shape: f32[8,256], index: 0, kind: input, shape index: {}]   ;;  %s184_s1 = inlined_call_operand.vmem [shape: f32[8,2], index: 1, kind: input, shape index: {}]   ;;  %s185_s2 = inlined_call_operand.hbm [shape: f32[8,256], index: 2, kind: output, shape index: {}]  }
   0x1   :  { %8 = vsyncpa [#allocation4], 0  ;;  %s14_s11 = sshll.u32 %s183_s0, 4  ;;  %s154_s12 = smov [#allocation2]   ;;  %s15_s11 = int_to_ptr.hbm [resolvable:$true] %s14_s11 }
   0x2   :  { %s16_s13 = sshll.u32 %s154_s12, 4  ;;  %s17_s13 = int_to_ptr.vmem [resolvable:$true] %s16_s13 }
   0x3   :  { %19 = dma.hbm_to_vmem [thread:$0]  %s15_s11, 256, %s17_s13, [#allocation3]  }
   0x4   :  { %150 = dma.done.wait [#allocation3], 256  }
   0x5   :  { %151 = vsyncadd [#allocation3], 4294967040  ;;  %v26_v0 = vld [vmem:[#allocation2] sm:$0xff]  ;;  %v27_v1 = vld [vmem:[#allocation2 + $0x8] sm:$0xff]  ;;  %v155_v8 = vmov 1   ;;  %s156_s15 = smov 127  }
   0x6   :  { %v28_v2 = vadd.f32 %v27_v1, %v26_v0  ;;  %v31_v3 = vmul.f32 %v26_v0, %v26_v0  ;;  %v32_v4 = vmul.f32 %v27_v1, %v27_v1  ;;  %97 = vset.pattern.permute.xlu1 %v155_v8  ;;  %v40_v19 = vld [vmem:[%s184_s1] sm:$0xff]  ;;  %v157_v24 = vmov 0   ;;  %s158_s16 = smov [#allocation5]   ;;  %s82_s19 = sshll.u32 %s185_s2, 4  ;;  %s83_s19 = int_to_ptr.hbm [resolvable:$true] %s82_s19 }
   0x7   :  { %98 = vset.pattern.permute.xlu2 %v157_v24  ;;  %99 = vset.pattern.permute.xlu0 %v157_v24  ;;  %s80_s17 = sshll.u32 %s158_s16, 4  ;;  %s81_s17 = int_to_ptr.vmem [resolvable:$true] %s80_s17 }
   0x8   :  { %29 = vadd.xlane.f32.xlu0 %v28_v2  ;;  %v33_v5 = vadd.f32 %v32_v4, %v31_v3 }
  0x10   :  { %34 = vadd.xlane.f32.xlu0 %v33_v5 }
  0x7b   :  { %v30_v6 = vpop.xlane.xlu0 %29 }
  0x7c   :  { %v36_v7 = vmul.f32 0.00390625, %v30_v6 }
  0x7e   :  { %v37_v9 = vmul.f32 %v36_v7, %v30_v6 }
  0x83   :  { %v35_v10 = vpop.xlane.xlu0 %34 }
  0x84   :  { %v38_v11 = vsub.f32 %v35_v10, %v37_v9 }
  0x86   :  { %v39_v12 = vmul.f32 0.003921569, %v38_v11 }
  0x88   :  { %v41_v13 = vadd.f32 1e-05, %v39_v12 }
  0x8a   :  { %100 = vrsqrt.f32 %v41_v13  ;;  %vm48_vm1 = vweird.f32 %v41_v13 }
  0x90   :  { %v101_v14 = vpop.eup %100 }
  0x91   :  { %v43_v15 = vmul.f32 %v101_v14, %v41_v13  ;;  %vm49_vm0 = vweird.f32 %v101_v14 }
  0x92   :  { %vm50_vm2 = vmor %vm48_vm1, %vm49_vm0 }
  0x93   :  { %v44_v16 = vmul.f32 %v101_v14, %v43_v15 }
  0x95   :  { %v45_v17 = vmul.f32 0.5, %v44_v16 }
  0x97   :  { %v46_v18 = vsub.f32 1.5, %v45_v17 }
  0x99   :  { %v47_v20 = vmul.f32 %v101_v14, %v46_v18 }
  0x9b   :  { %v51_v21 = vsel %vm50_vm2, %v101_v14, %v47_v20 }
  0x9c   :  { %v52_v22 = vmul.f32 %v51_v21, %v40_v19 }
  0x9e   :  { %v53_v23 = vmul.f32 %v52_v22, %v36_v7 }
  0xa0   :  { %55 = vrot.lane.b32.xlu1 %v53_v23, %s156_s15 }
  0xa8   :  { %61 = vperm.xlu1 %97, %v52_v22  }
 0x112   :  { %v56_v25 = vpop.permute.xlu1 %55 }
 0x113   :  { %v58_v26 = vsub.f32 %v40_v19, %v56_v25 }
 0x115   :  { %68 = vperm.xlu2 %98, %v58_v26  }
 0x11a   :  { %v62_v27 = vpop.permute.xlu1 %61 }
 0x11b   :  { %v64_v28 = vmul.f32 %v62_v27, %v26_v0  ;;  %v65_v29 = vmul.f32 %v62_v27, %v27_v1 }
 0x16f   :  { %v69_v30 = vpop.permute.xlu2 %68 }
 0x170   :  { %v71_v31 = vadd.f32 %v69_v30, %v64_v28  ;;  %v72_v32 = vadd.f32 %v69_v30, %v65_v29 }
 0x172   :  { %73 = vst [vmem:[#allocation5] sm:$0xff] %v71_v31 }
 0x173   :  { %74 = vst [vmem:[#allocation5 + $0x8] sm:$0xff] %v72_v32 }
 0x174   :  { %85 = dma.vmem_to_hbm [thread:$0]  %s81_s17, 256, %s83_s19, [#allocation4]  }
 0x175   :  { %152 = dma.done.wait [#allocation4], 256  }
 0x176   :  { %153 = vsyncadd [#allocation4], 4294967040 }
 0x177   :  { %90 = vsyncpa [#allocation3], 1 }
 0x178   :  { %91 = vsyncpa [#allocation4], 1 }

</bundles_post_ra>
